<compile_context>
chip_gen: v7x
topology: tpu7x:2x2x1
jax: 0.10.0
libtpu: 0.0.40
codegen_flags: <defaults>
</compile_context>

<pallas_src>
import math

import jax
import jax.numpy as jnp
from jax.experimental import pallas as pl
from jax.experimental.pallas import tpu as pltpu

_HIDDEN = 128


def _dqn_kernel(x_ref, w1_ref, b1_ref, w2_ref, b2_ref, w3_ref, b3_ref, o_ref):
    """One batch tile of the 3-layer MLP. Weights/biases are VMEM-resident."""
    x = x_ref[...]

    # Layer 1: tiny K (= n_obs), keep fully f32 -- no cast, no accuracy loss.
    h1 = jnp.dot(x, w1_ref[...], preferred_element_type=jnp.float32) + b1_ref[...]
    h1 = jnp.maximum(h1, 0.0)

    # Layers 2/3: bf16 operands (weights pre-cast in the wrapper), f32 accum.
    h2 = jnp.dot(h1.astype(jnp.bfloat16), w2_ref[...],
                 preferred_element_type=jnp.float32) + b2_ref[...]
    h2 = jnp.maximum(h2, 0.0)

    out = jnp.dot(h2.astype(jnp.bfloat16), w3_ref[...],
                  preferred_element_type=jnp.float32) + b3_ref[...]
    o_ref[...] = out.astype(o_ref.dtype)


def _round_up(v, m):
    return -(-v // m) * m


def _pick_batch_tiling(batch):
    """Return (padded_batch, tile_b).

    - Small batches (< 1024 rows): one grid step (no over-tiling).
    - Mid batches (<= 4096 rows): exactly 2 even steps so the "parallel" grid
      axis can be sharded across v7x's 2 TensorCores.
    - Large batches: 2048-row tiles (per-step overhead fully amortized, VMEM
      still comfortably inside the 16/32 MiB scoped defaults).
    """
    b_pad = max(8, _round_up(batch, 8))
    if b_pad < 1024:
        return b_pad, b_pad
    if b_pad <= 4096:
        tile = _round_up(_round_up(b_pad, 2) // 2, 8)
        return 2 * tile, tile
    tile = 2048
    return _round_up(b_pad, tile), tile


def dqn_forward(x, params):
    """x: (B, n_observations) float32; params: dict of w1,b1,w2,b2,w3,b3."""
    w1, b1 = params["w1"], params["b1"]
    w2, b2 = params["w2"], params["b2"]
    w3, b3 = params["w3"], params["b3"]

    batch, n_obs = x.shape
    n_actions = w3.shape[1]

    # Pre-cast grid-resident layer-2/3 weights to bf16 once (wrapper-side):
    # halves their DMA/VMEM footprint and removes per-step VPU packs.
    w2b = w2.astype(jnp.bfloat16)
    w3b = w3.astype(jnp.bfloat16)

    # Batch tiling (pad rows so every grid step is a full, aligned tile).
    b_pad, tile_b = _pick_batch_tiling(batch)
    x_in = jnp.pad(x, ((0, b_pad - batch), (0, 0))) if b_pad != batch else x
    grid = (b_pad // tile_b,)

    resident = lambda i: (0, 0)  # weights/biases stay in VMEM across all steps
    in_specs = [
        pl.BlockSpec((tile_b, n_obs), lambda i: (i, 0)),     # x tile
        pl.BlockSpec((n_obs, _HIDDEN), resident),            # w1 (f32)
        pl.BlockSpec((1, _HIDDEN), resident),                # b1
        pl.BlockSpec((_HIDDEN, _HIDDEN), resident),          # w2 (bf16)
        pl.BlockSpec((1, _HIDDEN), resident),                # b2
        pl.BlockSpec((_HIDDEN, n_actions), resident),        # w3 (bf16, narrow)
        pl.BlockSpec((1, n_actions), resident),              # b3 (narrow)
    ]
    # Narrow output: block last dim == full array last dim -> legal; avoids the
    # padded 128-lane writeback and the wrapper slice over the lane axis.
    out_spec = pl.BlockSpec((tile_b, n_actions), lambda i: (i, 0))

    flops = 2 * b_pad * (n_obs * _HIDDEN + _HIDDEN * _HIDDEN
                         + _HIDDEN * n_actions)
    bytes_accessed = (4 * (x_in.size + w1.size + b1.size + b2.size + b3.size
                           + b_pad * n_actions)
                      + 2 * (w2b.size + w3b.size))
    cost = pl.CostEstimate(flops=flops, transcendentals=0,
                           bytes_accessed=bytes_accessed)

    out_padded = pl.pallas_call(
        _dqn_kernel,
        out_shape=jax.ShapeDtypeStruct((b_pad, n_actions), jnp.float32),
        grid=grid,
        in_specs=in_specs,
        out_specs=out_spec,
        compiler_params=pltpu.CompilerParams(
            dimension_semantics=("parallel",)),
        cost_estimate=cost,
    )(x_in, w1, b1, w2b, b2, w3b, b3)

    return out_padded[:batch] if b_pad != batch else out_padded


def init_dqn_params(key, n_observations, n_actions):
    """Deterministic init matching PyTorch nn.Linear default U(-1/sqrt(fan_in), +)."""
    def linear(key, fan_in, fan_out):
        kw, kb = jax.random.split(key)
        bound = 1.0 / math.sqrt(fan_in)
        w = jax.random.uniform(kw, (fan_in, fan_out), jnp.float32, -bound, bound)
        b = jax.random.uniform(kb, (1, fan_out), jnp.float32, -bound, bound)
        return w, b

    k1, k2, k3 = jax.random.split(key, 3)
    w1, b1 = linear(k1, n_observations, _HIDDEN)
    w2, b2 = linear(k2, _HIDDEN, _HIDDEN)
    w3, b3 = linear(k3, _HIDDEN, n_actions)
    return {"w1": w1, "b1": b1, "w2": w2, "b2": b2, "w3": w3, "b3": b3}


def dqn_reference(x, params):
    """Plain-JAX f32 reference for correctness checking."""
    h1 = jnp.maximum(x @ params["w1"] + params["b1"], 0.0)
    h2 = jnp.maximum(h1 @ params["w2"] + params["b2"], 0.0)
    return h2 @ params["w3"] + params["b3"]


if __name__ == "__main__":
    # LunarLander-v2: 8 observations, 4 actions.
    n_observations, n_actions = 8, 4
    batch = 8

    key = jax.random.PRNGKey(0)
    k_params, k_x = jax.random.split(key)
    params = init_dqn_params(k_params, n_observations, n_actions)
    x = jax.random.normal(k_x, (batch, n_observations), jnp.float32)

    out = dqn_forward(x, params)
    out = jax.block_until_ready(out)

    ref = dqn_reference(x, params)
    assert out.shape == (batch, n_actions)
    # Layers 2/3 use bf16 weights/activations (f32 accumulation) -> small
    # tolerance vs the pure-f32 reference; layer 1 is exact f32.
    assert jnp.allclose(out, ref, atol=2e-2, rtol=2e-2), (
        float(jnp.max(jnp.abs(out - ref))))

    print("KERNEL_OK")
</pallas_src>

<mosaic_0001>
module attributes {stable_mosaic.version = 11 : i64} {
  func.func @_dqn_kernel(%arg0: i32, %arg1: memref<8x8xf32, #tpu.memory_space<vmem>>, %arg2: memref<8x128xf32, #tpu.memory_space<vmem>>, %arg3: memref<1x128xf32, #tpu.memory_space<vmem>>, %arg4: memref<128x128xbf16, #tpu.memory_space<vmem>>, %arg5: memref<1x128xf32, #tpu.memory_space<vmem>>, %arg6: memref<128x4xbf16, #tpu.memory_space<vmem>>, %arg7: memref<1x4xf32, #tpu.memory_space<vmem>>, %arg8: memref<8x4xf32, #tpu.memory_space<vmem>>) attributes {dimension_semantics = [#tpu.dimension_semantics<parallel>], iteration_bounds = array<i64: 1>, scalar_prefetch = 0 : i64, scratch_operands = 0 : i64, tpu.core_type = #tpu.core_type<tc>, window_params = [{transform_indices = @transform_0, window_bounds = array<i64: 8, 8>}, {pipeline_mode = #tpu.pipeline_mode<synchronous>, transform_indices = @transform_1, window_bounds = array<i64: 8, 128>}, {pipeline_mode = #tpu.pipeline_mode<synchronous>, transform_indices = @transform_2, window_bounds = array<i64: 1, 128>}, {pipeline_mode = #tpu.pipeline_mode<synchronous>, transform_indices = @transform_3, window_bounds = array<i64: 128, 128>}, {pipeline_mode = #tpu.pipeline_mode<synchronous>, transform_indices = @transform_4, window_bounds = array<i64: 1, 128>}, {pipeline_mode = #tpu.pipeline_mode<synchronous>, transform_indices = @transform_5, window_bounds = array<i64: 128, 4>}, {pipeline_mode = #tpu.pipeline_mode<synchronous>, transform_indices = @transform_6, window_bounds = array<i64: 1, 4>}, {transform_indices = @transform_7, window_bounds = array<i64: 8, 4>}]} {
    %c0 = arith.constant 0 : index
    %c0_0 = arith.constant 0 : index
    %0 = vector.load %arg1[%c0, %c0_0] : memref<8x8xf32, #tpu.memory_space<vmem>>, vector<8x8xf32>
    %c0_1 = arith.constant 0 : index
    %c0_2 = arith.constant 0 : index
    %1 = vector.load %arg2[%c0_1, %c0_2] : memref<8x128xf32, #tpu.memory_space<vmem>>, vector<8x128xf32>
    %cst = arith.constant dense<0.000000e+00> : vector<8x128xf32>
    %2 = tpu.matmul %0, %1, %cst {dimension_numbers = #tpu.dot_dimension_numbers<[1], [0], [0], [1], [0, 0, 1, 1], [], []>} : vector<8x8xf32>, vector<8x128xf32>, vector<8x128xf32> -> vector<8x128xf32>
    %c0_3 = arith.constant 0 : index
    %c0_4 = arith.constant 0 : index
    %3 = vector.load %arg3[%c0_3, %c0_4] : memref<1x128xf32, #tpu.memory_space<vmem>>, vector<1x128xf32>
    %4 = vector.broadcast %3 : vector<1x128xf32> to vector<8x128xf32>
    %5 = arith.addf %2, %4 : vector<8x128xf32>
    %cst_5 = arith.constant 0.000000e+00 : f32
    %6 = vector.broadcast %cst_5 : f32 to vector<8x128xf32>
    %7 = arith.maximumf %5, %6 : vector<8x128xf32>
    %8 = arith.truncf %7 : vector<8x128xf32> to vector<8x128xbf16>
    %c0_6 = arith.constant 0 : index
    %c0_7 = arith.constant 0 : index
    %9 = vector.load %arg4[%c0_6, %c0_7] : memref<128x128xbf16, #tpu.memory_space<vmem>>, vector<128x128xbf16>
    %cst_8 = arith.constant dense<0.000000e+00> : vector<8x128xf32>
    %10 = tpu.matmul %8, %9, %cst_8 {dimension_numbers = #tpu.dot_dimension_numbers<[1], [0], [0], [1], [0, 0, 1, 1], [], []>} : vector<8x128xbf16>, vector<128x128xbf16>, vector<8x128xf32> -> vector<8x128xf32>
    %c0_9 = arith.constant 0 : index
    %c0_10 = arith.constant 0 : index
    %11 = vector.load %arg5[%c0_9, %c0_10] : memref<1x128xf32, #tpu.memory_space<vmem>>, vector<1x128xf32>
    %12 = vector.broadcast %11 : vector<1x128xf32> to vector<8x128xf32>
    %13 = arith.addf %10, %12 : vector<8x128xf32>
    %cst_11 = arith.constant 0.000000e+00 : f32
    %14 = vector.broadcast %cst_11 : f32 to vector<8x128xf32>
    %15 = arith.maximumf %13, %14 : vector<8x128xf32>
    %16 = arith.truncf %15 : vector<8x128xf32> to vector<8x128xbf16>
    %c0_12 = arith.constant 0 : index
    %c0_13 = arith.constant 0 : index
    %17 = vector.load %arg6[%c0_12, %c0_13] : memref<128x4xbf16, #tpu.memory_space<vmem>>, vector<128x4xbf16>
    %cst_14 = arith.constant dense<0.000000e+00> : vector<8x4xf32>
    %18 = tpu.matmul %16, %17, %cst_14 {dimension_numbers = #tpu.dot_dimension_numbers<[1], [0], [0], [1], [0, 0, 1, 1], [], []>} : vector<8x128xbf16>, vector<128x4xbf16>, vector<8x4xf32> -> vector<8x4xf32>
    %c0_15 = arith.constant 0 : index
    %c0_16 = arith.constant 0 : index
    %19 = vector.load %arg7[%c0_15, %c0_16] : memref<1x4xf32, #tpu.memory_space<vmem>>, vector<1x4xf32>
    %20 = vector.broadcast %19 : vector<1x4xf32> to vector<8x4xf32>
    %21 = arith.addf %18, %20 : vector<8x4xf32>
    %c0_17 = arith.constant 0 : index
    %c0_18 = arith.constant 0 : index
    %22 = vector.load %arg8[%c0_17, %c0_18] : memref<8x4xf32, #tpu.memory_space<vmem>>, vector<8x4xf32>
    tpu.vector_store %arg8[%c0_17, %c0_18], %21 {strides = array<i32>} : memref<8x4xf32, #tpu.memory_space<vmem>>, vector<8x4xf32>,
    return
  }
  func.func @transform_0(%arg0: i32) -> (i32, i32) {
    %c0_i32 = arith.constant 0 : i32
    %c0_i32_0 = arith.constant 0 : i32
    return %arg0, %c0_i32 : i32, i32
  }
  func.func @transform_1(%arg0: i32) -> (i32, i32) {
    %c0_i32 = arith.constant 0 : i32
    %c0_i32_0 = arith.constant 0 : i32
    %c0_i32_1 = arith.constant 0 : i32
    return %c0_i32, %c0_i32_0 : i32, i32
  }
  func.func @transform_2(%arg0: i32) -> (i32, i32) {
    %c0_i32 = arith.constant 0 : i32
    %c0_i32_0 = arith.constant 0 : i32
    %c0_i32_1 = arith.constant 0 : i32
    return %c0_i32, %c0_i32_0 : i32, i32
  }
  func.func @transform_3(%arg0: i32) -> (i32, i32) {
    %c0_i32 = arith.constant 0 : i32
    %c0_i32_0 = arith.constant 0 : i32
    %c0_i32_1 = arith.constant 0 : i32
    return %c0_i32, %c0_i32_0 : i32, i32
  }
  func.func @transform_4(%arg0: i32) -> (i32, i32) {
    %c0_i32 = arith.constant 0 : i32
    %c0_i32_0 = arith.constant 0 : i32
    %c0_i32_1 = arith.constant 0 : i32
    return %c0_i32, %c0_i32_0 : i32, i32
  }
  func.func @transform_5(%arg0: i32) -> (i32, i32) {
    %c0_i32 = arith.constant 0 : i32
    %c0_i32_0 = arith.constant 0 : i32
    %c0_i32_1 = arith.constant 0 : i32
    return %c0_i32, %c0_i32_0 : i32, i32
  }
  func.func @transform_6(%arg0: i32) -> (i32, i32) {
    %c0_i32 = arith.constant 0 : i32
    %c0_i32_0 = arith.constant 0 : i32
    %c0_i32_1 = arith.constant 0 : i32
    return %c0_i32, %c0_i32_0 : i32, i32
  }
  func.func @transform_7(%arg0: i32) -> (i32, i32) {
    %c0_i32 = arith.constant 0 : i32
    %c0_i32_0 = arith.constant 0 : i32
    return %arg0, %c0_i32 : i32, i32
  }
}

</mosaic_0001>

<bundles_post_ra>
// kernel: tpu_custom_call.1
= control target key start
LH: loop header
LB: loop body
LE: loop exit
PB: predicated region body
PF: predicated region fallthrough
CT: control target
= control target key end

     0   :  { %12 = vsyncpa [#allocation3], 0  ;;  %s483_s24 = smov [#allocation2]   ;;  %s601_s0 = inlined_call_operand.vmem [shape: f32[8,8], index: 0, kind: input, shape index: {}]   ;;  %s602_s1 = inlined_call_operand.hbm [shape: f32[8,128], index: 1, kind: input, shape index: {}]   ;;  %s603_s2 = inlined_call_operand.vmem [shape: f32[1,128], index: 2, kind: input, shape index: {}]   ;;  %s604_s3 = inlined_call_operand.vmem [shape: bf16[128,128], index: 3, kind: input, shape index: {}]   ;;  %s605_s4 = inlined_call_operand.vmem [shape: f32[1,128], index: 4, kind: input, shape index: {}]   ;;  %s606_s5 = inlined_call_operand.vmem [shape: bf16[128,4], index: 5, kind: input, shape index: {}]   ;;  %s607_s6 = inlined_call_operand.vmem [shape: f32[1,4], index: 6, kind: input, shape index: {}]   ;;  %s608_s7 = inlined_call_operand.vmem [shape: f32[8,4], index: 7, kind: output, shape index: {}]  }
   0x1   :  { %s21_s25 = sshll.u32 %s483_s24, 4  ;;  %s459_s28 = scalar_lea.hbm %s602_s1, 128  ;;  %s22_s25 = int_to_ptr.vmem [resolvable:$true] %s21_s25 }
   0x2   :  { %p460_p0 = scmp.ne.s32.totalorder %s602_s1, %s459_s28  ;;  %p463_p1 = scmp.lt.u32.totalorder %s459_s28, %s602_s1 }
   0x4   :  { %p465_p2 = pnand %p463_p1, %p460_p0 }
   0x6   :  { %468 = shalt.err (!%p465_p2)
}
   0x7   :  { %s469_s10 = scalar_lea.vmem %s22_s25, 128  ;;  %p474_p4 = scmp.lt.s32.totalorder %s22_s25, %s22_s25 }
   0x8   :  { %p470_p3 = scmp.ne.s32.totalorder %s22_s25, %s469_s10  ;;  %p475_p5 = scmp.lt.s32.totalorder %s469_s10, %s469_s10 }
   0xa   :  { %p476_p6 = por %p475_p5, %p474_p4 }
   0xc   :  { %p477_p7 = pnand %p476_p6, %p470_p3 }
   0xe   :  { %480 = shalt.err (!%p477_p7)
}
   0xf   :  { %24 = dma.hbm_to_vmem [thread:$0]  %s602_s1, 128, %s22_s25, [#allocation3]  }
  0x10   :  { %481 = dma.done.wait [#allocation3], 128  }
  0x11   :  { %482 = vsyncadd [#allocation3], 4294967168  ;;  %v484_v0 = vmov 0.0   ;;  %vm485_vm0 = vmmov 0   ;;  %vm48_vm1 = vcmask 64512   ;;  %v40_v1 = vld [vmem:[#allocation2] sm:$0xff] }
  0x12   :  { %395 = vmatprep.subr.mxu0 %v484_v0  ;;  %397 = vmatprep.mubr.msk.f32.mxu0 %vm485_vm0, %v484_v0  ;;  %v39_v2 = vld [vmem:[%s601_s0] sm:$0xff]  ;;  %v444_v4 = vld [vmem:[%s604_s3 + $0x8] sm:$0xff]   ;;  %v445_v5 = vld [vmem:[%s604_s3 + $0x10] sm:$0xff]   ;;  %vm348_vm2 = vcmask 31744  }
  0x13   :  { %400 = vmatprep.subr.bf16.mxu1 %v484_v0  ;;  %416 = vmatprep.mubr.msk.bf16.mxu1 %vm485_vm0, %v484_v0  ;;  %v443_v3 = vld [vmem:[%s604_s3] sm:$0xff]   ;;  %v446_v6 = vld [vmem:[%s604_s3 + $0x18] sm:$0xff]   ;;  %v448_v8 = vld [vmem:[%s604_s3 + $0x28] sm:$0xff]  }
  0x14   :  { %396 = vmatpush3.msra.mxu0 %v40_v1  ;;  %401 = vmatpush3.bf16.msra.mxu1 %v443_v3  ;;  %v447_v7 = vld [vmem:[%s604_s3 + $0x20] sm:$0xff]   ;;  %v449_v9 = vld [vmem:[%s604_s3 + $0x30] sm:$0xff]   ;;  %v450_v10 = vld [vmem:[%s604_s3 + $0x38] sm:$0xff]  }
  0x15   :  { %398 = vmatmul.mubr.msk.f32.vlgmr.msra.gmra.mrb[0].mxu0 %vm48_vm1, %v39_v2  ;;  %420 = vmatprep.subr.bf16.mxu0 %v484_v0  ;;  %v451_v11 = vld [vmem:[%s606_s5] sm:$0xff]   ;;  %v452_v12 = vld [vmem:[%s606_s5 + $0x8] sm:$0xff]   ;;  %v453_v13 = vld [vmem:[%s606_s5 + $0x10] sm:$0xff]  }
  0x16   :  { %436 = vmatprep.mubr.msk.bf16.mxu0 %vm485_vm0, %v484_v0  ;;  %402 = vmatprep.subr.bf16.mxu1 %v484_v0  ;;  %v454_v14 = vld [vmem:[%s606_s5 + $0x18] sm:$0xff]   ;;  %v455_v15 = vld [vmem:[%s606_s5 + $0x20] sm:$0xff]   ;;  %v456_v16 = vld [vmem:[%s606_s5 + $0x28] sm:$0xff]  }
  0x17   :  { %421 = vmatpush3.bf16.msra.mxu0 %v451_v11  ;;  %v355_v17 = vld [vmem:[%s603_s2] ss:$0 sm:$0xff]  ;;  %v457_v23 = vld [vmem:[%s606_s5 + $0x30] sm:$0xff]   ;;  %v458_v24 = vld [vmem:[%s606_s5 + $0x38] sm:$0xff]  }
  0x18   :  { %403 = vmatpush3.bf16.msra.mxu1 %v444_v4  ;;  %422 = vmatprep.subr.bf16.mxu0 %v484_v0  ;;  %v357_v25 = vld [vmem:[%s605_s4] ss:$0 sm:$0xff] }
  0x19   :  { %404 = vmatprep.subr.bf16.mxu1 %v484_v0  ;;  %v366_v33 = vld [vmem:[%s607_s6] ss:$0 sm:$0xff] }
  0x1b   :  { %423 = vmatpush3.bf16.msra.mxu0 %v452_v12 }
  0x1c   :  { %405 = vmatpush3.bf16.msra.mxu1 %v445_v5  ;;  %424 = vmatprep.subr.bf16.mxu0 %v484_v0 }
  0x1d   :  { %406 = vmatprep.subr.bf16.mxu1 %v484_v0 }
  0x1f   :  { %425 = vmatpush3.bf16.msra.mxu0 %v453_v13 }
  0x20   :  { %407 = vmatpush3.bf16.msra.mxu1 %v446_v6  ;;  %426 = vmatprep.subr.bf16.mxu0 %v484_v0 }
  0x21   :  { %408 = vmatprep.subr.bf16.mxu1 %v484_v0 }
  0x23   :  { %427 = vmatpush3.bf16.msra.mxu0 %v454_v14 }
  0x24   :  { %409 = vmatpush3.bf16.msra.mxu1 %v447_v7  ;;  %428 = vmatprep.subr.bf16.mxu0 %v484_v0 }
  0x25   :  { %410 = vmatprep.subr.bf16.mxu1 %v484_v0 }
  0x27   :  { %429 = vmatpush3.bf16.msra.mxu0 %v455_v15 }
  0x28   :  { %411 = vmatpush3.bf16.msra.mxu1 %v448_v8  ;;  %430 = vmatprep.subr.bf16.mxu0 %v484_v0 }
  0x29   :  { %412 = vmatprep.subr.bf16.mxu1 %v484_v0 }
  0x2b   :  { %431 = vmatpush3.bf16.msra.mxu0 %v456_v16 }
  0x2c   :  { %413 = vmatpush3.bf16.msra.mxu1 %v449_v9  ;;  %432 = vmatprep.subr.bf16.mxu0 %v484_v0 }
  0x2d   :  { %414 = vmatprep.subr.bf16.mxu1 %v484_v0 }
  0x2f   :  { %433 = vmatpush3.bf16.msra.mxu0 %v457_v23 }
  0x30   :  { %415 = vmatpush3.bf16.msra.mxu1 %v450_v10  ;;  %434 = vmatprep.subr.bf16.mxu0 %v484_v0 }
  0x33   :  { %435 = vmatpush3.bf16.msra.mxu0 %v458_v24 }
  0xe8   :  { %v118_v18 = vpop.f32.mrb[0].mxu0 }
  0xe9   :  { %v119_v19 = vadd.f32 %v355_v17, %v118_v18  ;;  %v399_v20 = vpop.f32.mrb[1].mxu0 }
  0xeb   :  { %v122_v21 = vmax.f32 %v119_v19, 0.0 }
  0xed   :  { %v123_v22 = vpack.c.bf16 %v122_v21, %v122_v21 }
  0xef   :  { %417 = vmatmul.mubr.bf16.vlgmr.msra.gmra.mrb[0].mxu1 %v123_v22 }
 0x1c2   :  { %v229_v26 = vpop.f32.mrb[0].mxu1 }
 0x1c3   :  { %v230_v27 = vadd.f32 %v357_v25, %v229_v26  ;;  %v418_v28 = vpop.f32.mrb[1].mxu1 }
 0x1c4   :  { %v232_v29 = vpop.f32.mrb[2].mxu1 }
 0x1c5   :  { %v235_v30 = vmax.f32 %v230_v27, 0.0  ;;  %v419_v31 = vpop.f32.mrb[3].mxu1 }
 0x1c7   :  { %v236_v32 = vpack.c.bf16 %v235_v30, %v235_v30 }
 0x1c9   :  { %437 = vmatmul.mubr.bf16.vlgmr.msra.gmra.mrb[4].mxu0 %v236_v32 }
 0x29c   :  { %v342_v34 = vpop.f32.mrb[4].mxu0 }
 0x29d   :  { %v343_v35 = vadd.f32 %v366_v33, %v342_v34  ;;  %v438_v36 = vpop.f32.mrb[5].mxu0 }
 0x29e   :  { %v345_v37 = vpop.f32.mrb[6].mxu0 }
 0x29f   :  { %349 = vst.msk [vmem:[%s608_s7] sm:$0xff] %vm348_vm2, %v343_v35  ;;  %v439_v38 = vpop.f32.mrb[7].mxu0 }
 0x2a0   :  { %354 = vsyncpa [#allocation3], 1 }

</bundles_post_ra>
